<compile_context>
chip_gen: v7x
topology: tpu7x:2x2x1
jax: 0.10.0
libtpu: 0.0.40
codegen_flags: <defaults>
</compile_context>

<pallas_src>
import numpy as np

import jax
import jax.numpy as jnp
from jax import lax
from jax.experimental import pallas as pl
from jax.experimental.pallas import tpu as pltpu


def _round_up(x, m):
    return ((x + m - 1) // m) * m


def _vmem_capacity_bytes():
    try:
        info = pltpu.get_tpu_info()
        v = getattr(info, "vmem_capacity_bytes", None)
        if v:
            return int(v)
    except Exception:
        pass
    return 128 * 1024 * 1024  # v5e / v6e physical VMEM


def _num_tensorcores():
    try:
        info = pltpu.get_tpu_info()
        for name in ("num_cores", "tensor_core_count", "num_tensorcores", "core_count"):
            v = getattr(info, name, None)
            if v:
                return int(v)
    except Exception:
        pass
    try:
        v = getattr(jax.devices()[0], "num_cores", None)
        if v:
            return int(v)
    except Exception:
        pass
    # Heuristic: v7x has 64 MiB VMEM per TensorCore and 2 TCs/chip; v5e/v6e
    # have 128 MiB and a single TC.
    return 2 if _vmem_capacity_bytes() <= 64 * 1024 * 1024 else 1


def _make_kernel(N, C, S, TS, CH, KT):
    """Partial dice reduction for one spatial tile, chunked along lanes."""
    NR = N * C
    n_chunks = TS // CH

    def kernel(logits_ref, seg_ref, inter_ref, den_ref):
        p = pl.program_id(0)
        k = pl.program_id(1)

        @pl.when(k == 0)
        def _():
            inter_ref[...] = jnp.zeros_like(inter_ref)
            den_ref[...] = jnp.zeros_like(den_ref)

        tile_idx = p * KT + k
        base = tile_idx * TS

        # Per-row target channel: rows are (n, c) pairs in n-major order, so the
        # pattern is [0..C-1] repeated N times.  Built once per grid step
        # (hoisted out of the chunk loop).
        ch_col = lax.broadcasted_iota(jnp.int32, (C, 1), 0)
        ch_rows = ch_col if N == 1 else jnp.concatenate([ch_col] * N, axis=0)  # (NR, 1)

        def accum(lg, sg):
            # lg: (NR, CH) f32 logits rows; sg: (N, CH) int32 segmentation.
            sg = jnp.where(sg == 4, 3, sg)                      # label remap 4 -> 3
            if N == 1:
                seg_rows = jnp.broadcast_to(sg, (NR, CH))
            else:
                seg_rows = jnp.concatenate(
                    [jnp.broadcast_to(sg[n:n + 1, :], (C, CH)) for n in range(N)],
                    axis=0)                                      # (NR, CH)
            mask = seg_rows == ch_rows                           # bool one-hot, never f32
            inter_part = jnp.sum(jnp.where(mask, lg, 0.0), axis=-1, keepdims=True)
            cnt = jnp.sum(mask, axis=-1, keepdims=True).astype(jnp.float32)
            lsum = jnp.sum(lg, axis=-1, keepdims=True)
            inter_ref[...] += inter_part[None]                   # (1, NR, 1)
            den_ref[...] += (lsum + cnt)[None]

        interior = base + TS <= S    # every lane of this tile is in range

        @pl.when(interior)
        def _():
            # Fast path: no iota, no masking selects on interior tiles.
            @pl.loop(0, n_chunks)
            def _(ci):
                off = pl.multiple_of(ci * CH, CH)
                lg = logits_ref[:, pl.ds(off, CH)].astype(jnp.float32)
                sg = seg_ref[:, pl.ds(off, CH)]
                accum(lg, sg)

        @pl.when(jnp.logical_not(interior))
        def _():
            # Tail tile (or fully-clamped duplicate from the parallel split):
            # mask lanes past S so padded / re-read data contributes zero.
            @pl.loop(0, n_chunks)
            def _(ci):
                off = pl.multiple_of(ci * CH, CH)
                lane = base + off + lax.broadcasted_iota(jnp.int32, (1, CH), 1)
                valid = lane < S
                lg = jnp.where(valid,
                               logits_ref[:, pl.ds(off, CH)].astype(jnp.float32), 0.0)
                sg = jnp.where(valid, seg_ref[:, pl.ds(off, CH)], -1)
                accum(lg, sg)

    return kernel


def dice_loss_pallas(logits, targets, labels, epsilon=1e-5, ignore_index=None,
                     tile_s=None, num_parallel=None):
    """logits: (N, C, D, H, W); targets: (N, D, H, W) integer segmentation map."""
    N, C = int(logits.shape[0]), int(logits.shape[1])
    assert C == len(labels)
    S = int(np.prod(logits.shape[2:]))
    NR = N * C

    # Row-fold (N, C) -> N*C rows; keep the native logits dtype (upcast happens
    # per chunk inside the kernel).
    logits2 = jnp.reshape(logits, (NR, S))
    seg2 = jnp.reshape(targets, (N, S)).astype(jnp.int32)

    itemsize = jnp.dtype(logits2.dtype).itemsize
    sublane = {4: 8, 2: 16, 1: 32}.get(itemsize, 8)
    # VMEM bytes per spatial lane for the double-buffered input blocks
    # (sublane padding included).
    per_lane = 2 * (_round_up(NR, sublane) * itemsize + _round_up(N, 8) * 4)

    vmem_cap = _vmem_capacity_bytes()

    # Inner compute chunk: bounds per-op temporaries to ~32K elements while the
    # DMA'd grid tile stays large.
    CH = max(128, (32768 // max(NR, 1)) // 128 * 128)

    if tile_s is None:
        # ~3/8 of physical VMEM for double-buffered inputs: ~48 MiB on v5e/v6e
        # (128 MiB VMEM), ~24 MiB on v7x (64 MiB VMEM) -- generation-aware.
        in_budget = (3 * vmem_cap) // 8
        tile_s = (in_budget // per_lane) // 128 * 128
        tile_s = int(min(max(tile_s, 512), 1 << 20))
    tile_s = int(min(_round_up(int(tile_s), 128), _round_up(S, 128)))
    if tile_s >= CH:
        tile_s = (tile_s // CH) * CH        # whole number of compute chunks
    else:
        CH = tile_s

    num_tiles = int(pl.cdiv(S, tile_s))
    if num_parallel is None:
        num_parallel = _num_tensorcores()   # 2 on v7x, 1 on v5e/v6e
    num_slices = int(max(1, min(int(num_parallel), num_tiles)))
    KT = int(pl.cdiv(num_tiles, num_slices))        # spatial tiles per slice

    kernel = _make_kernel(N, C, S, tile_s, CH, KT)

    in_bytes = per_lane * tile_s
    vmem_limit = int(min(max(32 * 1024 * 1024, in_bytes + (8 << 20)),
                         (3 * vmem_cap) // 4))      # <=48 MiB on v7x, <=96 MiB v5e/v6e

    def spatial_block(p, k):
        # Clamp so slices whose tiles run past the end re-read a valid block;
        # their contribution is zeroed by the in-kernel tail mask.
        return jnp.minimum(p * KT + k, num_tiles - 1)

    inter, den = pl.pallas_call(
        kernel,
        out_shape=(jax.ShapeDtypeStruct((num_slices, NR, 1), jnp.float32),
                   jax.ShapeDtypeStruct((num_slices, NR, 1), jnp.float32)),
        grid=(num_slices, KT),
        in_specs=[
            pl.BlockSpec((NR, tile_s), lambda p, k: (0, spatial_block(p, k))),
            pl.BlockSpec((N, tile_s), lambda p, k: (0, spatial_block(p, k))),
        ],
        out_specs=(
            pl.BlockSpec((1, NR, 1), lambda p, k: (p, 0, 0)),
            pl.BlockSpec((1, NR, 1), lambda p, k: (p, 0, 0)),
        ),
        compiler_params=pltpu.CompilerParams(
            dimension_semantics=("parallel", "arbitrary"),
            vmem_limit_bytes=vmem_limit),
    )(logits2, seg2)

    # ---- tiny (N, C) finalize outside the kernel ----------------------------
    inter = jnp.sum(inter, axis=0)[:, 0].reshape(N, C)
    den = jnp.sum(den, axis=0)[:, 0].reshape(N, C)
    dice = 2.0 * inter / (den + epsilon)
    per_c = jnp.mean(1.0 - dice, axis=0)            # mean over batch, per channel

    # Channel include mask replicating PyTorch's
    # `if not self.ignore_index or i != int(self.ignore_index)`
    # (ignore_index=0 is falsy there, so channel 0 is never excluded).
    include = np.ones((C,), dtype=np.float32)
    if ignore_index:
        include[int(ignore_index)] = 0.0
    return jnp.sum(per_c * jnp.asarray(include))


def dice_loss_ref(logits, targets, labels, epsilon=1e-5, ignore_index=None):
    """Pure NumPy reference mirroring the PyTorch forward."""
    logits = np.asarray(logits, dtype=np.float32)
    seg = np.asarray(targets).copy()
    seg[seg == 4] = 3
    N, C = logits.shape[0], logits.shape[1]
    tot = 0.0
    for i in range(C):
        if not ignore_index or i != int(ignore_index):
            lg = logits[:, i].reshape(N, -1)
            tg = (seg == i).astype(np.float32).reshape(N, -1)
            inter = (lg * tg).sum(-1)
            dice = 2.0 * inter / ((lg + tg).sum(-1) + epsilon)
            tot += np.mean(1.0 - dice)
    return np.float32(tot)


if __name__ == "__main__":
    labels = [0, 1, 2, 3]                      # 4 classes (label 4 remapped to 3)
    N, C, D, H, W = 2, len(labels), 3, 9, 9    # S = 243 (exercises tail masking)

    key = jax.random.PRNGKey(0)
    k1, k2 = jax.random.split(key)
    logits = jax.random.uniform(k1, (N, C, D, H, W), dtype=jnp.float32)
    targets = jax.random.randint(k2, (N, D, H, W), 0, 5, dtype=jnp.int32)

    configs = [
        dict(ignore_index=None, tile_s=None),   # auto-sized single tile + tail mask
        dict(ignore_index=None, tile_s=128),    # multi-tile + parallel axis
        dict(ignore_index=2, tile_s=128),       # channel exclusion path
    ]
    for cfg in configs:
        out = dice_loss_pallas(logits, targets, labels, epsilon=1e-5, **cfg)
        out = jax.block_until_ready(out)
        ref = dice_loss_ref(np.asarray(logits), np.asarray(targets), labels,
                            epsilon=1e-5, ignore_index=cfg["ignore_index"])
        assert np.allclose(np.asarray(out), ref, rtol=1e-4, atol=1e-4), (cfg, out, ref)

    # Native bf16 logits path (kernel upcasts per chunk; no wrapper f32 copy).
    logits_bf16 = logits.astype(jnp.bfloat16)
    out = jax.block_until_ready(dice_loss_pallas(logits_bf16, targets, labels))
    ref = dice_loss_ref(np.asarray(logits_bf16).astype(np.float32),
                        np.asarray(targets), labels)
    assert np.allclose(np.asarray(out), ref, rtol=1e-3, atol=1e-3), (out, ref)

    print("KERNEL_OK")
</pallas_src>

<mosaic_0001>
module attributes {stable_mosaic.version = 11 : i64} {
  func.func @kernel(%arg0: i32, %arg1: i32, %arg2: memref<8x256xf32, #tpu.memory_space<vmem>>, %arg3: memref<2x256xi32, #tpu.memory_space<vmem>>, %arg4: memref<1x8x1xf32, #tpu.memory_space<vmem>>, %arg5: memref<1x8x1xf32, #tpu.memory_space<vmem>>) attributes {dimension_semantics = [#tpu.dimension_semantics<parallel>, #tpu.dimension_semantics<arbitrary>], iteration_bounds = array<i64: 1, 1>, scalar_prefetch = 0 : i64, scratch_operands = 0 : i64, tpu.core_type = #tpu.core_type<tc>, window_params = [{transform_indices = @transform_0, window_bounds = array<i64: 8, 256>}, {transform_indices = @transform_1, window_bounds = array<i64: 2, 256>}, {transform_indices = @transform_2, window_bounds = array<i64: 1, 8, 1>}, {transform_indices = @transform_3, window_bounds = array<i64: 1, 8, 1>}]} {
    %c0_i32 = arith.constant 0 : i32
    %0 = arith.cmpi eq, %arg1, %c0_i32 : i32
    %1 = arith.extui %0 : i1 to i32
    %c0_i32_0 = arith.constant 0 : i32
    %2 = arith.cmpi ne, %1, %c0_i32_0 : i32
    scf.if %2 {
      %cst = arith.constant 0.000000e+00 : f32
      %15 = vector.broadcast %cst : f32 to vector<1x8x1xf32>
      %c0 = arith.constant 0 : index
      %c0_4 = arith.constant 0 : index
      %c0_5 = arith.constant 0 : index
      %16 = vector.load %arg4[%c0, %c0_4, %c0_5] : memref<1x8x1xf32, #tpu.memory_space<vmem>>, vector<1x8x1xf32>
      tpu.vector_store %arg4[%c0, %c0_4, %c0_5], %15 {strides = array<i32>} : memref<1x8x1xf32, #tpu.memory_space<vmem>>, vector<1x8x1xf32>,
      %cst_6 = arith.constant 0.000000e+00 : f32
      %17 = vector.broadcast %cst_6 : f32 to vector<1x8x1xf32>
      %c0_7 = arith.constant 0 : index
      %c0_8 = arith.constant 0 : index
      %c0_9 = arith.constant 0 : index
      %18 = vector.load %arg5[%c0_7, %c0_8, %c0_9] : memref<1x8x1xf32, #tpu.memory_space<vmem>>, vector<1x8x1xf32>
      tpu.vector_store %arg5[%c0_7, %c0_8, %c0_9], %17 {strides = array<i32>} : memref<1x8x1xf32, #tpu.memory_space<vmem>>, vector<1x8x1xf32>,
    } else {
    }
    %c1_i32 = arith.constant 1 : i32
    %3 = arith.muli %arg0, %c1_i32 : i32
    %4 = arith.addi %3, %arg1 : i32
    %c256_i32 = arith.constant 256 : i32
    %5 = arith.muli %4, %c256_i32 : i32
    %6 = tpu.iota {dimensions = array<i32: 0>} : vector<4x1xi32>
    %7 = tpu.concatenate %6, %6 in 0 : vector<4x1xi32>, vector<4x1xi32> -> vector<8x1xi32>
    %c256_i32_1 = arith.constant 256 : i32
    %8 = arith.addi %5, %c256_i32_1 : i32
    %c243_i32 = arith.constant 243 : i32
    %9 = arith.cmpi sle, %8, %c243_i32 : i32
    %10 = arith.extui %9 : i1 to i32
    %c0_i32_2 = arith.constant 0 : i32
    %11 = arith.cmpi ne, %10, %c0_i32_2 : i32
    scf.if %11 {
      %c0_i32_4 = arith.constant 0 : i32
      %c1_i32_5 = arith.constant 1 : i32
      %15 = arith.muli %c0_i32_4, %c1_i32_5 : i32
      %c0_i32_6 = arith.constant 0 : i32
      %16 = arith.addi %c0_i32_6, %15 : i32
      %c256_i32_7 = arith.constant 256 : i32
      %17 = arith.muli %16, %c256_i32_7 : i32
      %18 = tpu.assume_multiple %17, 256 : i32
      %c0 = arith.constant 0 : index
      %19 = arith.index_cast %18 : i32 to index
      %20 = vector.load %arg2[%c0, %19] : memref<8x256xf32, #tpu.memory_space<vmem>>, vector<8x256xf32>
      %c0_8 = arith.constant 0 : index
      %21 = arith.index_cast %18 : i32 to index
      %22 = vector.load %arg3[%c0_8, %21] : memref<2x256xi32, #tpu.memory_space<vmem>>, vector<2x256xi32>
      %c4_i32 = arith.constant 4 : i32
      %23 = vector.broadcast %c4_i32 : i32 to vector<2x256xi32>
      %24 = arith.cmpi eq, %22, %23 : vector<2x256xi32>
      %c3_i32 = arith.constant 3 : i32
      %25 = vector.broadcast %c3_i32 : i32 to vector<2x256xi32>
      %26 = arith.select %24, %25, %22 : vector<2x256xi1>, vector<2x256xi32>
      %27 = vector.extract_strided_slice %26 {offsets = [0, 0], sizes = [1, 256], strides = [1, 1]} : vector<2x256xi32> to vector<1x256xi32>
      %28 = vector.shape_cast %27 : vector<1x256xi32> to vector<1x256xi32>
      %29 = vector.broadcast %28 : vector<1x256xi32> to vector<4x256xi32>
      %30 = vector.extract_strided_slice %26 {offsets = [1, 0], sizes = [1, 256], strides = [1, 1]} : vector<2x256xi32> to vector<1x256xi32>
      %31 = vector.shape_cast %30 : vector<1x256xi32> to vector<1x256xi32>
      %32 = vector.broadcast %31 : vector<1x256xi32> to vector<4x256xi32>
      %33 = tpu.concatenate %29, %32 in 0 : vector<4x256xi32>, vector<4x256xi32> -> vector<8x256xi32>
      %34 = vector.broadcast %7 : vector<8x1xi32> to vector<8x256xi32>
      %35 = arith.cmpi eq, %33, %34 : vector<8x256xi32>
      %cst = arith.constant 0.000000e+00 : f32
      %36 = vector.broadcast %cst : f32 to vector<8x256xf32>
      %37 = arith.select %35, %20, %36 : vector<8x256xi1>, vector<8x256xf32>
      %cst_9 = arith.constant dense<0.000000e+00> : vector<8xf32>
      %38 = vector.multi_reduction <add>, %37, %cst_9 [1] : vector<8x256xf32> to vector<8xf32>
      %39 = vector.shape_cast %38 : vector<8xf32> to vector<8x1xf32>
      %40 = arith.extui %35 : vector<8x256xi1> to vector<8x256xi32>
      %cst_10 = arith.constant dense<0> : vector<8xi32>
      %41 = vector.multi_reduction <add>, %40, %cst_10 [1] : vector<8x256xi32> to vector<8xi32>
      %42 = vector.shape_cast %41 : vector<8xi32> to vector<8x1xi32>
      %43 = arith.sitofp %42 : vector<8x1xi32> to vector<8x1xf32>
      %cst_11 = arith.constant dense<0.000000e+00> : vector<8xf32>
      %44 = vector.multi_reduction <add>, %20, %cst_11 [1] : vector<8x256xf32> to vector<8xf32>
      %45 = vector.shape_cast %44 : vector<8xf32> to vector<8x1xf32>
      %c0_12 = arith.constant 0 : index
      %c0_13 = arith.constant 0 : index
      %c0_14 = arith.constant 0 : index
      %46 = vector.load %arg4[%c0_12, %c0_13, %c0_14] : memref<1x8x1xf32, #tpu.memory_space<vmem>>, vector<1x8x1xf32>
      %47 = vector.shape_cast %39 : vector<8x1xf32> to vector<1x8x1xf32>
      %48 = arith.addf %46, %47 : vector<1x8x1xf32>
      %c0_15 = arith.constant 0 : index
      %c0_16 = arith.constant 0 : index
      %c0_17 = arith.constant 0 : index
      %49 = vector.load %arg4[%c0_15, %c0_16, %c0_17] : memref<1x8x1xf32, #tpu.memory_space<vmem>>, vector<1x8x1xf32>
      tpu.vector_store %arg4[%c0_15, %c0_16, %c0_17], %48 {strides = array<i32>} : memref<1x8x1xf32, #tpu.memory_space<vmem>>, vector<1x8x1xf32>,
      %c0_18 = arith.constant 0 : index
      %c0_19 = arith.constant 0 : index
      %c0_20 = arith.constant 0 : index
      %50 = vector.load %arg5[%c0_18, %c0_19, %c0_20] : memref<1x8x1xf32, #tpu.memory_space<vmem>>, vector<1x8x1xf32>
      %51 = arith.addf %45, %43 : vector<8x1xf32>
      %52 = vector.shape_cast %51 : vector<8x1xf32> to vector<1x8x1xf32>
      %53 = arith.addf %50, %52 : vector<1x8x1xf32>
      %c0_21 = arith.constant 0 : index
      %c0_22 = arith.constant 0 : index
      %c0_23 = arith.constant 0 : index
      %54 = vector.load %arg5[%c0_21, %c0_22, %c0_23] : memref<1x8x1xf32, #tpu.memory_space<vmem>>, vector<1x8x1xf32>
      tpu.vector_store %arg5[%c0_21, %c0_22, %c0_23], %53 {strides = array<i32>} : memref<1x8x1xf32, #tpu.memory_space<vmem>>, vector<1x8x1xf32>,
      %c1_i32_24 = arith.constant 1 : i32
    } else {
    }
    %true = arith.constant true
    %12 = arith.xori %9, %true : i1
    %13 = arith.extui %12 : i1 to i32
    %c0_i32_3 = arith.constant 0 : i32
    %14 = arith.cmpi ne, %13, %c0_i32_3 : i32
    scf.if %14 {
      %c0_i32_4 = arith.constant 0 : i32
      %c1_i32_5 = arith.constant 1 : i32
      %15 = arith.muli %c0_i32_4, %c1_i32_5 : i32
      %c0_i32_6 = arith.constant 0 : i32
      %16 = arith.addi %c0_i32_6, %15 : i32
      %c256_i32_7 = arith.constant 256 : i32
      %17 = arith.muli %16, %c256_i32_7 : i32
      %18 = tpu.assume_multiple %17, 256 : i32
      %19 = arith.addi %5, %18 : i32
      %20 = tpu.iota {dimensions = array<i32: 1>} : vector<1x256xi32>
      %21 = vector.broadcast %19 : i32 to vector<1x256xi32>
      %22 = arith.addi %21, %20 : vector<1x256xi32>
      %c243_i32_8 = arith.constant 243 : i32
      %23 = vector.broadcast %c243_i32_8 : i32 to vector<1x256xi32>
      %24 = arith.cmpi slt, %22, %23 : vector<1x256xi32>
      %c0 = arith.constant 0 : index
      %25 = arith.index_cast %18 : i32 to index
      %26 = vector.load %arg2[%c0, %25] : memref<8x256xf32, #tpu.memory_space<vmem>>, vector<8x256xf32>
      %cst = arith.constant 0.000000e+00 : f32
      %27 = vector.shape_cast %24 : vector<1x256xi1> to vector<1x256xi1>
      %28 = vector.broadcast %27 : vector<1x256xi1> to vector<8x256xi1>
      %29 = vector.broadcast %cst : f32 to vector<8x256xf32>
      %30 = arith.select %28, %26, %29 : vector<8x256xi1>, vector<8x256xf32>
      %c0_9 = arith.constant 0 : index
      %31 = arith.index_cast %18 : i32 to index
      %32 = vector.load %arg3[%c0_9, %31] : memref<2x256xi32, #tpu.memory_space<vmem>>, vector<2x256xi32>
      %c-1_i32 = arith.constant -1 : i32
      %33 = vector.shape_cast %24 : vector<1x256xi1> to vector<1x256xi1>
      %34 = vector.broadcast %33 : vector<1x256xi1> to vector<2x256xi1>
      %35 = vector.broadcast %c-1_i32 : i32 to vector<2x256xi32>
      %36 = arith.select %34, %32, %35 : vector<2x256xi1>, vector<2x256xi32>
      %c4_i32 = arith.constant 4 : i32
      %37 = vector.broadcast %c4_i32 : i32 to vector<2x256xi32>
      %38 = arith.cmpi eq, %36, %37 : vector<2x256xi32>
      %c3_i32 = arith.constant 3 : i32
      %39 = vector.broadcast %c3_i32 : i32 to vector<2x256xi32>
      %40 = arith.select %38, %39, %36 : vector<2x256xi1>, vector<2x256xi32>
      %41 = vector.extract_strided_slice %40 {offsets = [0, 0], sizes = [1, 256], strides = [1, 1]} : vector<2x256xi32> to vector<1x256xi32>
      %42 = vector.shape_cast %41 : vector<1x256xi32> to vector<1x256xi32>
      %43 = vector.broadcast %42 : vector<1x256xi32> to vector<4x256xi32>
      %44 = vector.extract_strided_slice %40 {offsets = [1, 0], sizes = [1, 256], strides = [1, 1]} : vector<2x256xi32> to vector<1x256xi32>
      %45 = vector.shape_cast %44 : vector<1x256xi32> to vector<1x256xi32>
      %46 = vector.broadcast %45 : vector<1x256xi32> to vector<4x256xi32>
      %47 = tpu.concatenate %43, %46 in 0 : vector<4x256xi32>, vector<4x256xi32> -> vector<8x256xi32>
      %48 = vector.broadcast %7 : vector<8x1xi32> to vector<8x256xi32>
      %49 = arith.cmpi eq, %47, %48 : vector<8x256xi32>
      %cst_10 = arith.constant 0.000000e+00 : f32
      %50 = vector.broadcast %cst_10 : f32 to vector<8x256xf32>
      %51 = arith.select %49, %30, %50 : vector<8x256xi1>, vector<8x256xf32>
      %cst_11 = arith.constant dense<0.000000e+00> : vector<8xf32>
      %52 = vector.multi_reduction <add>, %51, %cst_11 [1] : vector<8x256xf32> to vector<8xf32>
      %53 = vector.shape_cast %52 : vector<8xf32> to vector<8x1xf32>
      %54 = arith.extui %49 : vector<8x256xi1> to vector<8x256xi32>
      %cst_12 = arith.constant dense<0> : vector<8xi32>
      %55 = vector.multi_reduction <add>, %54, %cst_12 [1] : vector<8x256xi32> to vector<8xi32>
      %56 = vector.shape_cast %55 : vector<8xi32> to vector<8x1xi32>
      %57 = arith.sitofp %56 : vector<8x1xi32> to vector<8x1xf32>
      %cst_13 = arith.constant dense<0.000000e+00> : vector<8xf32>
      %58 = vector.multi_reduction <add>, %30, %cst_13 [1] : vector<8x256xf32> to vector<8xf32>
      %59 = vector.shape_cast %58 : vector<8xf32> to vector<8x1xf32>
      %c0_14 = arith.constant 0 : index
      %c0_15 = arith.constant 0 : index
      %c0_16 = arith.constant 0 : index
      %60 = vector.load %arg4[%c0_14, %c0_15, %c0_16] : memref<1x8x1xf32, #tpu.memory_space<vmem>>, vector<1x8x1xf32>
      %61 = vector.shape_cast %53 : vector<8x1xf32> to vector<1x8x1xf32>
      %62 = arith.addf %60, %61 : vector<1x8x1xf32>
      %c0_17 = arith.constant 0 : index
      %c0_18 = arith.constant 0 : index
      %c0_19 = arith.constant 0 : index
      %63 = vector.load %arg4[%c0_17, %c0_18, %c0_19] : memref<1x8x1xf32, #tpu.memory_space<vmem>>, vector<1x8x1xf32>
      tpu.vector_store %arg4[%c0_17, %c0_18, %c0_19], %62 {strides = array<i32>} : memref<1x8x1xf32, #tpu.memory_space<vmem>>, vector<1x8x1xf32>,
      %c0_20 = arith.constant 0 : index
      %c0_21 = arith.constant 0 : index
      %c0_22 = arith.constant 0 : index
      %64 = vector.load %arg5[%c0_20, %c0_21, %c0_22] : memref<1x8x1xf32, #tpu.memory_space<vmem>>, vector<1x8x1xf32>
      %65 = arith.addf %59, %57 : vector<8x1xf32>
      %66 = vector.shape_cast %65 : vector<8x1xf32> to vector<1x8x1xf32>
      %67 = arith.addf %64, %66 : vector<1x8x1xf32>
      %c0_23 = arith.constant 0 : index
      %c0_24 = arith.constant 0 : index
      %c0_25 = arith.constant 0 : index
      %68 = vector.load %arg5[%c0_23, %c0_24, %c0_25] : memref<1x8x1xf32, #tpu.memory_space<vmem>>, vector<1x8x1xf32>
      tpu.vector_store %arg5[%c0_23, %c0_24, %c0_25], %67 {strides = array<i32>} : memref<1x8x1xf32, #tpu.memory_space<vmem>>, vector<1x8x1xf32>,
      %c1_i32_26 = arith.constant 1 : i32
    } else {
    }
    return
  }
  func.func @transform_0(%arg0: i32, %arg1: i32) -> (i32, i32) {
    %c1_i32 = arith.constant 1 : i32
    %0 = arith.muli %arg0, %c1_i32 : i32
    %1 = arith.addi %0, %arg1 : i32
    %c0_i32 = arith.constant 0 : i32
    %2 = arith.minsi %1, %c0_i32 : i32
    %c0_i32_0 = arith.constant 0 : i32
    %c0_i32_1 = arith.constant 0 : i32
    return %c0_i32_0, %2 : i32, i32
  }
  func.func @transform_1(%arg0: i32, %arg1: i32) -> (i32, i32) {
    %c1_i32 = arith.constant 1 : i32
    %0 = arith.muli %arg0, %c1_i32 : i32
    %1 = arith.addi %0, %arg1 : i32
    %c0_i32 = arith.constant 0 : i32
    %2 = arith.minsi %1, %c0_i32 : i32
    %c0_i32_0 = arith.constant 0 : i32
    %c0_i32_1 = arith.constant 0 : i32
    return %c0_i32_0, %2 : i32, i32
  }
  func.func @transform_2(%arg0: i32, %arg1: i32) -> (i32, i32, i32) {
    %c0_i32 = arith.constant 0 : i32
    %c0_i32_0 = arith.constant 0 : i32
    %c0_i32_1 = arith.constant 0 : i32
    return %arg0, %c0_i32, %c0_i32_0 : i32, i32, i32
  }
  func.func @transform_3(%arg0: i32, %arg1: i32) -> (i32, i32, i32) {
    %c0_i32 = arith.constant 0 : i32
    %c0_i32_0 = arith.constant 0 : i32
    %c0_i32_1 = arith.constant 0 : i32
    return %arg0, %c0_i32, %c0_i32_0 : i32, i32, i32
  }
}

</mosaic_0001>

<bundles_post_ra>
// kernel: tpu_custom_call.1
= control target key start
LH: loop header
LB: loop body
LE: loop exit
PB: predicated region body
PF: predicated region fallthrough
CT: control target
= control target key end

     0   :  { %9 = vsyncpa [#allocation3], 0  ;;  %s386_s0 = inlined_call_operand.hbm [shape: f32[8,243], index: 0, kind: input, shape index: {}]   ;;  %s387_s1 = inlined_call_operand.hbm [shape: s32[2,243], index: 1, kind: input, shape index: {}]   ;;  %s388_s2 = inlined_call_operand.vmem [shape: f32[1,8,1], index: 2, kind: output, shape index: {0}]   ;;  %s389_s3 = inlined_call_operand.vmem [shape: f32[1,8,1], index: 3, kind: output, shape index: {1}]  }
   0x1   :  { %10 = vsyncpa [#allocation5], 0  ;;  %s311_s12 = smov [#allocation2]   ;;  %s312_s14 = smov [#allocation4]  }
   0x2   :  { %s23_s13 = sshll.u32 %s311_s12, 4  ;;  %s39_s15 = sshll.u32 %s312_s14, 4  ;;  %s24_s13 = int_to_ptr.vmem [resolvable:$true] %s23_s13  ;;  %s40_s15 = int_to_ptr.vmem [resolvable:$true] %s39_s15 }
   0x3   :  { %s263_s18 = scalar_lea.hbm %s386_s0, 256 }
   0x4   :  { %p264_p0 = scmp.ne.s32.totalorder %s386_s0, %s263_s18  ;;  %p267_p1 = scmp.lt.u32.totalorder %s263_s18, %s386_s0 }
   0x6   :  { %p269_p2 = pnand %p267_p1, %p264_p0 }
   0x8   :  { %272 = shalt.err (!%p269_p2)
}
   0x9   :  { %s273_s23 = scalar_lea.vmem %s24_s13, 256  ;;  %p278_p4 = scmp.lt.s32.totalorder %s24_s13, %s24_s13 }
   0xa   :  { %p274_p3 = scmp.ne.s32.totalorder %s24_s13, %s273_s23  ;;  %p279_p5 = scmp.lt.s32.totalorder %s273_s23, %s273_s23 }
   0xc   :  { %p280_p6 = por %p279_p5, %p278_p4 }
   0xe   :  { %p281_p7 = pnand %p280_p6, %p274_p3 }
  0x10   :  { %284 = shalt.err (!%p281_p7)
}
  0x11   :  { %26 = dma.hbm_to_vmem [thread:$0]  %s386_s0, 256, %s24_s13, [#allocation3]  }
  0x12   :  { %s285_s28 = scalar_lea.hbm %s387_s1, 64 }
  0x13   :  { %p286_p8 = scmp.ne.s32.totalorder %s387_s1, %s285_s28  ;;  %p289_p9 = scmp.lt.u32.totalorder %s285_s28, %s387_s1 }
  0x15   :  { %p291_p10 = pnand %p289_p9, %p286_p8 }
  0x17   :  { %294 = shalt.err (!%p291_p10)
}
  0x18   :  { %s295_s6 = scalar_lea.vmem %s40_s15, 64  ;;  %p300_p12 = scmp.lt.s32.totalorder %s40_s15, %s40_s15 }
  0x19   :  { %p296_p11 = scmp.ne.s32.totalorder %s40_s15, %s295_s6  ;;  %p301_p13 = scmp.lt.s32.totalorder %s295_s6, %s295_s6 }
  0x1b   :  { %p302_p0 = por %p301_p13, %p300_p12 }
  0x1d   :  { %p303_p1 = pnand %p302_p0, %p296_p11 }
  0x1f   :  { %306 = shalt.err (!%p303_p1)
}
  0x20   :  { %42 = dma.hbm_to_vmem [thread:$0]  %s387_s1, 64, %s40_s15, [#allocation5]  }
  0x21   :  { %307 = dma.done.wait [#allocation3], 256  }
  0x22   :  { %308 = vsyncadd [#allocation3], 4294967040  ;;  %v66_v0 = vlaneseq }
  0x23   :  { %309 = dma.done.wait [#allocation5], 64  }
  0x24   :  { %310 = vsyncadd [#allocation5], 4294967232  ;;  %v313_v1 = vmov 0   ;;  %v67_v2 = vshrl.u32 %v66_v0, 7  ;;  %v158_v3 = vand.u32 127, %v66_v0  ;;  %vm69_vm0 = vcmask 1043456  }
  0x25   :  { %262 = vset.pattern.permute.xlu0 %v313_v1  ;;  %v257_v9 = vld.sshfl [vmem:[#allocation4] sm:$0x33 pattern:$0x76325410]  ;;  %v166_v20 = vld [vmem:[#allocation2 + $0x8] sm:$0xff]  ;;  %v165_v21 = vld [vmem:[#allocation2] sm:$0xff] }
  0x26   :  { %v68_v4 = vrot.slane %v67_v2, 4  ;;  %v159_v5 = vadd.s32 128, %v158_v3  ;;  %v190_v7 = vsub.s32 0, %v67_v2  ;;  %v198_v8 = vsub.s32 1, %v67_v2 }
  0x27   :  { %v181_v10 = vcombine.high %v257_v9, %v257_v9  ;;  %vm184_vm2 = vcmp.eq.s32.totalorder %v257_v9, 4  ;;  %vm61_vm6 = vcmask 7168   ;;  %v314_v35 = vmov 0.0  }
  0x28   :  { %v70_v6 = vsel %vm69_vm0, %v67_v2, %v68_v4  ;;  %vm164_vm1 = vcmp.lt.s32.totalorder %v159_v5, 243  ;;  %v186_v11 = vsel %vm184_vm2, 3, %v257_v9  ;;  %63 = vst.msk [vmem:[%s389_s3] sm:$0xff] %vm61_vm6, %v314_v35  ;;  %62 = vst.msk [vmem:[%s388_s2] sm:$0xff] %vm61_vm6, %v314_v35 }
  0x29   :  { %207 = vperm.xlu0 %262, %v70_v6   ;;  %v183_v12 = vsel %vm164_vm1, %v181_v10, 4294967295  ;;  %v191_v13 = vrot.slane %v186_v11, %v190_v7  ;;  %v199_v14 = vrot.slane %v186_v11, %v198_v8  ;;  %v172_v22 = vsel %vm164_vm1, %v166_v20, 0.0 }
  0x2a   :  { %vm185_vm3 = vcmp.eq.s32.totalorder %v183_v12, 4  ;;  %v232_v34 = vadd.f32 %v172_v22, %v165_v21 }
  0x2b   :  { %v187_v15 = vsel %vm185_vm3, 3, %v183_v12  ;;  %v204_v16 = vsel %vm69_vm0, %v191_v13, %v199_v14 }
  0x2c   :  { %v195_v17 = vrot.slane %v187_v15, %v190_v7  ;;  %v203_v18 = vrot.slane %v187_v15, %v198_v8 }
  0x2e   :  { %v205_v19 = vsel %vm69_vm0, %v195_v17, %v203_v18 }
  0x2f   :  { %v235_v43 = vld [vmem:[%s388_s2] sm:$0xff] }
  0x30   :  { %v239_v45 = vld [vmem:[%s389_s3] sm:$0xff] }
  0xa8   :  { %v208_v23 = vpop.permute.xlu0 %207 }
  0xa9   :  { %vm209_vm4 = vcmp.eq.s32.totalorder %v204_v16, %v208_v23  ;;  %vm210_vm5 = vcmp.eq.s32.totalorder %v205_v19, %v208_v23 }
  0xaa   :  { %v216_v24 = vsel %vm209_vm4, 1, %v313_v1  ;;  %v217_v25 = vsel %vm210_vm5, 1, %v313_v1  ;;  %v211_v26 = vsel %vm209_vm4, %v165_v21, 0.0  ;;  %v212_v27 = vsel %vm210_vm5, %v172_v22, 0.0 }
  0xab   :  { %v218_v28 = vadd.s32 %v217_v25, %v216_v24  ;;  %v213_v29 = vadd.f32 %v212_v27, %v211_v26 }
  0xad   :  { %v220_v30 = vshrl.u32 %v218_v28, 16  ;;  %v219_v31 = vand.u32 65535, %v218_v28 }
  0xaf   :  { %v222_v32 = vcvt.s32.f32 %v220_v30  ;;  %v221_v33 = vcvt.s32.f32 %v219_v31 }
  0xb1   :  { %225 = vadd.xlane.f32.xlu0 %v222_v32  ;;  %223 = vadd.xlane.f32.xlu1 %v221_v33 }
  0xb5   :  { %233 = vadd.xlane.f32.xlu1 %v232_v34 }
  0xb9   :  { %214 = vadd.xlane.f32.xlu1 %v213_v29 }
 0x13e   :  { %v226_v36 = vpop.xlane.xlu0 %225  ;;  %v224_v37 = vpop.xlane.xlu1 %223 }
 0x13f   :  { %v228_v38 = vcvt.f32.s32 %v226_v36  ;;  %v227_v40 = vcvt.f32.s32 %v224_v37 }
 0x141   :  { %v229_v39 = vshll.u32 %v228_v38, 16 }
 0x142   :  { %v234_v41 = vpop.xlane.xlu1 %233 }
 0x143   :  { %v230_v42 = vadd.s32 %v229_v39, %v227_v40 }
 0x145   :  { %v231_v44 = vcvt.s32.f32 %v230_v42 }
 0x146   :  { %v215_v46 = vpop.xlane.xlu1 %214 }
 0x147   :  { %v240_v47 = vadd.f32 %v234_v41, %v231_v44  ;;  %v236_v48 = vadd.f32 %v235_v43, %v215_v46 }
 0x149   :  { %v241_v49 = vadd.f32 %v240_v47, %v239_v45  ;;  %238 = vst.msk [vmem:[%s388_s2] sm:$0xff] %vm61_vm6, %v236_v48 }
 0x14b   :  { %242 = vst.msk [vmem:[%s389_s3] sm:$0xff] %vm61_vm6, %v241_v49 }
 0x14c   :  { %251 = vsyncpa [#allocation3], 1 }
 0x14d   :  { %252 = vsyncpa [#allocation5], 1 }

</bundles_post_ra>
